<compile_context>
chip_gen: v7x
topology: tpu7x:2x2x1
jax: 0.10.0
libtpu: 0.0.40
codegen_flags: <defaults>
</compile_context>

<pallas_src>
import jax
import jax.numpy as jnp
from jax.experimental import pallas as pl
from jax.experimental.pallas import tpu as pltpu


def add_norm_kernel(x_ref, sub_ref, gb_ref, o_ref):
    # x_ref, sub_ref, o_ref: (TILE_ROWS, D); gb_ref: (2, D) fp32 (gamma, beta)
    x = x_ref[...].astype(jnp.float32)
    s = sub_ref[...].astype(jnp.float32)
    y = x + s
    mean = jnp.mean(y, axis=-1, keepdims=True)
    centered = y - mean
    var = jnp.mean(centered * centered, axis=-1, keepdims=True)
    inv = jax.lax.rsqrt(var + 1e-5)
    gamma = gb_ref[0:1, :]
    beta = gb_ref[1:2, :]
    o_ref[...] = ((centered * inv) * gamma + beta).astype(o_ref.dtype)


# Per-input-tile DMA byte target (~4 MiB => ~12 MiB total traffic per step).
_PER_TILE_BYTE_TARGET = 4 * 1024 * 1024
# Only force a multi-step grid (for v7x's 2 TCs) if the split tile still moves
# at least this much per input stream.
_MIN_SPLIT_TILE_BYTES = 1 * 1024 * 1024
_MIN_GRID_STEPS = 8


def _vmem_capacity_bytes():
    try:
        cap = int(pltpu.get_tpu_info().vmem_capacity_bytes)
        if cap > 0:
            return cap
    except Exception:
        pass
    return 64 * 1024 * 1024  # conservative (v7x-sized) fallback


def _sublane_multiple(itemsize):
    # 8 for fp32, 16 for bf16/fp16, 32 for int8/fp8.
    return max(8, 32 // int(itemsize))


def _pick_tile_rows(rows, d_model, itemsize, vmem_budget):
    sub = _sublane_multiple(itemsize)
    row_bytes = d_model * itemsize
    # 6 live row-tiles: (x, sublayer, out) x double buffer.
    t_budget = max(sub, vmem_budget // (6 * row_bytes))
    t_target = max(sub, _PER_TILE_BYTE_TARGET // row_bytes)
    t = min(t_budget, t_target)
    if t >= rows:
        # Single block spanning the full row extent (block == full dim is
        # always legal, no sublane-multiple requirement).
        return rows
    # Keep >= _MIN_GRID_STEPS grid steps so v7x can shard across 2 TensorCores,
    # but only if that still leaves reasonably large tiles.
    t_cap = -(-rows // _MIN_GRID_STEPS)  # cdiv
    t_cap = max(sub, ((t_cap + sub - 1) // sub) * sub)
    if t_cap * row_bytes >= _MIN_SPLIT_TILE_BYTES:
        t = min(t, t_cap)
    return max(sub, (t // sub) * sub)


def add_norm(x, sublayer, gamma, beta, *, tile_rows=None):
    """LayerNorm(x + sublayer) over the last dim, Pallas TPU kernel."""
    assert x.shape == sublayer.shape
    orig_shape = x.shape
    d_model = orig_shape[-1]
    rows = 1
    for s in orig_shape[:-1]:
        rows *= s

    x2 = x.reshape(rows, d_model)
    s2 = sublayer.reshape(rows, d_model)
    # Cast params to fp32 once here (not per grid step) and fuse into a single
    # (2, d_model) operand: gamma in row 0, beta in row 1.
    gb = jnp.stack(
        [gamma.reshape(d_model), beta.reshape(d_model)], axis=0
    ).astype(jnp.float32)

    itemsize = jnp.dtype(x.dtype).itemsize
    vmem_cap = _vmem_capacity_bytes()
    vmem_budget = int(vmem_cap * 0.45)
    if tile_rows is None:
        tile_rows = _pick_tile_rows(rows, d_model, itemsize, vmem_budget)

    # Ragged last block handled by Pallas (OOB output writes are masked); no
    # wrapper-side padding copies.  LayerNorm is per-row so undefined OOB input
    # rows never affect valid output rows.
    grid = (pl.cdiv(rows, tile_rows),)

    # Scoped VMEM: pipeline buffers plus headroom, capped at ~85% of physical.
    working = 6 * tile_rows * d_model * itemsize
    working += 2 * 2 * d_model * 4  # (2, d_model) fp32 params, double-buffered
    vmem_limit = min(int(vmem_cap * 0.85), max(working + 8 * 1024 * 1024,
                                               32 * 1024 * 1024))

    out = pl.pallas_call(
        add_norm_kernel,
        out_shape=jax.ShapeDtypeStruct((rows, d_model), x.dtype),
        grid_spec=pltpu.PrefetchScalarGridSpec(
            num_scalar_prefetch=0,
            grid=grid,
            in_specs=[
                pl.BlockSpec((tile_rows, d_model), lambda i: (i, 0)),
                pl.BlockSpec((tile_rows, d_model), lambda i: (i, 0)),
                pl.BlockSpec((2, d_model), lambda i: (0, 0)),
            ],
            out_specs=pl.BlockSpec((tile_rows, d_model), lambda i: (i, 0)),
        ),
        compiler_params=pltpu.CompilerParams(
            dimension_semantics=("parallel",),
            vmem_limit_bytes=int(vmem_limit),
        ),
    )(x2, s2, gb)

    return out.reshape(orig_shape)


def _reference(x, sublayer, gamma, beta):
    y = x.astype(jnp.float32) + sublayer.astype(jnp.float32)
    mean = jnp.mean(y, axis=-1, keepdims=True)
    var = jnp.mean((y - mean) ** 2, axis=-1, keepdims=True)
    return (y - mean) / jnp.sqrt(var + 1e-5) * gamma.astype(jnp.float32) + beta.astype(
        jnp.float32
    )


if __name__ == "__main__":
    key = jax.random.PRNGKey(0)

    # --- Test 1: fp32, lane-dense d_model=128, single block -----------------
    batch, seq, d_model = 2, 8, 128
    kx, ks, key = (*jax.random.split(key, 2), key)
    x = jax.random.normal(kx, (batch, seq, d_model), dtype=jnp.float32)
    sub = jax.random.normal(ks, (batch, seq, d_model), dtype=jnp.float32)
    gamma = jnp.ones((d_model,), dtype=jnp.float32)   # nn.LayerNorm init
    beta = jnp.zeros((d_model,), dtype=jnp.float32)

    out = jax.block_until_ready(add_norm(x, sub, gamma, beta))
    ref = _reference(x, sub, gamma, beta)
    assert jnp.allclose(out, ref, atol=1e-5, rtol=1e-5), "fp32 mismatch"

    # --- Test 2: fp32, ragged last block (rows=15, tile_rows=8) -------------
    kx2, ks2, kg2, kb2 = jax.random.split(jax.random.PRNGKey(1), 4)
    x2 = jax.random.normal(kx2, (3, 5, d_model), dtype=jnp.float32)
    sub2 = jax.random.normal(ks2, (3, 5, d_model), dtype=jnp.float32)
    gamma2 = jax.random.normal(kg2, (d_model,), dtype=jnp.float32)
    beta2 = jax.random.normal(kb2, (d_model,), dtype=jnp.float32)
    out2 = jax.block_until_ready(add_norm(x2, sub2, gamma2, beta2, tile_rows=8))
    ref2 = _reference(x2, sub2, gamma2, beta2)
    assert jnp.allclose(out2, ref2, atol=1e-5, rtol=1e-5), "ragged fp32 mismatch"

    # --- Test 3: bf16 I/O, fp32 stats, ragged (rows=40, tile_rows=16) -------
    kx3, ks3 = jax.random.split(jax.random.PRNGKey(2), 2)
    x3 = jax.random.normal(kx3, (5, 8, d_model), dtype=jnp.float32).astype(jnp.bfloat16)
    sub3 = jax.random.normal(ks3, (5, 8, d_model), dtype=jnp.float32).astype(
        jnp.bfloat16
    )
    gamma3 = jnp.ones((d_model,), dtype=jnp.bfloat16)
    beta3 = jnp.zeros((d_model,), dtype=jnp.bfloat16)
    out3 = jax.block_until_ready(add_norm(x3, sub3, gamma3, beta3, tile_rows=16))
    ref3 = _reference(x3, sub3, gamma3, beta3)
    assert jnp.allclose(
        out3.astype(jnp.float32), ref3, atol=2e-2, rtol=2e-2
    ), "bf16 mismatch"

    print("KERNEL_OK")
</pallas_src>

<mosaic_0001>
module attributes {stable_mosaic.version = 11 : i64} {
  func.func @add_norm_kernel(%arg0: i32, %arg1: memref<16x128xf32, #tpu.memory_space<vmem>>, %arg2: memref<16x128xf32, #tpu.memory_space<vmem>>, %arg3: memref<2x128xf32, #tpu.memory_space<vmem>>, %arg4: memref<16x128xf32, #tpu.memory_space<vmem>>) attributes {dimension_semantics = [#tpu.dimension_semantics<parallel>], iteration_bounds = array<i64: 1>, scalar_prefetch = 0 : i64, scratch_operands = 0 : i64, tpu.core_type = #tpu.core_type<tc>, window_params = [{transform_indices = @transform_0, window_bounds = array<i64: 16, 128>}, {transform_indices = @transform_1, window_bounds = array<i64: 16, 128>}, {pipeline_mode = #tpu.pipeline_mode<synchronous>, transform_indices = @transform_2, window_bounds = array<i64: 2, 128>}, {transform_indices = @transform_3, window_bounds = array<i64: 16, 128>}]} {
    %c0 = arith.constant 0 : index
    %c0_0 = arith.constant 0 : index
    %0 = vector.load %arg1[%c0, %c0_0] : memref<16x128xf32, #tpu.memory_space<vmem>>, vector<16x128xf32>
    %c0_1 = arith.constant 0 : index
    %c0_2 = arith.constant 0 : index
    %1 = vector.load %arg2[%c0_1, %c0_2] : memref<16x128xf32, #tpu.memory_space<vmem>>, vector<16x128xf32>
    %2 = arith.addf %0, %1 : vector<16x128xf32>
    %cst = arith.constant dense<0.000000e+00> : vector<16xf32>
    %3 = vector.multi_reduction <add>, %2, %cst [1] : vector<16x128xf32> to vector<16xf32>
    %4 = vector.shape_cast %3 : vector<16xf32> to vector<16x1xf32>
    %cst_3 = arith.constant 1.280000e+02 : f32
    %5 = vector.broadcast %cst_3 : f32 to vector<16x1xf32>
    %6 = arith.divf %4, %5 : vector<16x1xf32>
    %7 = vector.broadcast %6 : vector<16x1xf32> to vector<16x128xf32>
    %8 = arith.subf %2, %7 : vector<16x128xf32>
    %9 = arith.mulf %8, %8 : vector<16x128xf32>
    %cst_4 = arith.constant dense<0.000000e+00> : vector<16xf32>
    %10 = vector.multi_reduction <add>, %9, %cst_4 [1] : vector<16x128xf32> to vector<16xf32>
    %11 = vector.shape_cast %10 : vector<16xf32> to vector<16x1xf32>
    %cst_5 = arith.constant 1.280000e+02 : f32
    %12 = vector.broadcast %cst_5 : f32 to vector<16x1xf32>
    %13 = arith.divf %11, %12 : vector<16x1xf32>
    %cst_6 = arith.constant 9.99999974E-6 : f32
    %14 = vector.broadcast %cst_6 : f32 to vector<16x1xf32>
    %15 = arith.addf %13, %14 : vector<16x1xf32>
    %16 = math.rsqrt %15 : vector<16x1xf32>
    %c0_7 = arith.constant 0 : index
    %c0_8 = arith.constant 0 : index
    %17 = vector.load %arg3[%c0_7, %c0_8] : memref<2x128xf32, #tpu.memory_space<vmem>>, vector<1x128xf32>
    %c1 = arith.constant 1 : index
    %c0_9 = arith.constant 0 : index
    %18 = vector.load %arg3[%c1, %c0_9] : memref<2x128xf32, #tpu.memory_space<vmem>>, vector<1x128xf32>
    %19 = vector.broadcast %16 : vector<16x1xf32> to vector<16x128xf32>
    %20 = arith.mulf %8, %19 : vector<16x128xf32>
    %21 = vector.broadcast %17 : vector<1x128xf32> to vector<16x128xf32>
    %22 = arith.mulf %20, %21 : vector<16x128xf32>
    %23 = vector.broadcast %18 : vector<1x128xf32> to vector<16x128xf32>
    %24 = arith.addf %22, %23 : vector<16x128xf32>
    %c0_10 = arith.constant 0 : index
    %c0_11 = arith.constant 0 : index
    %25 = vector.load %arg4[%c0_10, %c0_11] : memref<16x128xf32, #tpu.memory_space<vmem>>, vector<16x128xf32>
    tpu.vector_store %arg4[%c0_10, %c0_11], %24 {strides = array<i32>} : memref<16x128xf32, #tpu.memory_space<vmem>>, vector<16x128xf32>,
    return
  }
  func.func @transform_0(%arg0: i32) -> (i32, i32) {
    %c0_i32 = arith.constant 0 : i32
    %c0_i32_0 = arith.constant 0 : i32
    return %arg0, %c0_i32 : i32, i32
  }
  func.func @transform_1(%arg0: i32) -> (i32, i32) {
    %c0_i32 = arith.constant 0 : i32
    %c0_i32_0 = arith.constant 0 : i32
    return %arg0, %c0_i32 : i32, i32
  }
  func.func @transform_2(%arg0: i32) -> (i32, i32) {
    %c0_i32 = arith.constant 0 : i32
    %c0_i32_0 = arith.constant 0 : i32
    %c0_i32_1 = arith.constant 0 : i32
    return %c0_i32, %c0_i32_0 : i32, i32
  }
  func.func @transform_3(%arg0: i32) -> (i32, i32) {
    %c0_i32 = arith.constant 0 : i32
    %c0_i32_0 = arith.constant 0 : i32
    return %arg0, %c0_i32 : i32, i32
  }
}

</mosaic_0001>

<bundles_post_ra>
// kernel: tpu_custom_call.1
= control target key start
LH: loop header
LB: loop body
LE: loop exit
PB: predicated region body
PF: predicated region fallthrough
CT: control target
= control target key end

     0   :  { %8 = vsyncpa [#allocation3], 0  ;;  %s265_s0 = inlined_call_operand.hbm [shape: f32[16,128], index: 0, kind: input, shape index: {}]   ;;  %s266_s1 = inlined_call_operand.hbm [shape: f32[16,128], index: 1, kind: input, shape index: {}]   ;;  %s267_s2 = inlined_call_operand.vmem [shape: f32[2,128], index: 2, kind: input, shape index: {}]   ;;  %s268_s3 = inlined_call_operand.hbm [shape: f32[16,128], index: 3, kind: output, shape index: {}]  }
   0x1   :  { %9 = vsyncpa [#allocation6], 0 }
   0x2   :  { %10 = vsyncpa [#allocation4], 0  ;;  %s189_s12 = smov [#allocation2]   ;;  %s117_s16 = scalar_lea.hbm %s265_s0, 256 }
   0x3   :  { %s16_s13 = sshll.u32 %s189_s12, 4  ;;  %p118_p0 = scmp.ne.s32.totalorder %s265_s0, %s117_s16  ;;  %s17_s13 = int_to_ptr.vmem [resolvable:$true] %s16_s13 }
   0x4   :  { %p121_p1 = scmp.lt.u32.totalorder %s117_s16, %s265_s0 }
   0x6   :  { %p123_p2 = pnand %p121_p1, %p118_p0 }
   0x8   :  { %126 = shalt.err (!%p123_p2)
}
   0x9   :  { %s127_s21 = scalar_lea.vmem %s17_s13, 256  ;;  %p132_p4 = scmp.lt.s32.totalorder %s17_s13, %s17_s13 }
   0xa   :  { %p128_p3 = scmp.ne.s32.totalorder %s17_s13, %s127_s21  ;;  %p133_p5 = scmp.lt.s32.totalorder %s127_s21, %s127_s21 }
   0xc   :  { %p134_p6 = por %p133_p5, %p132_p4 }
   0xe   :  { %p135_p7 = pnand %p134_p6, %p128_p3 }
  0x10   :  { %138 = shalt.err (!%p135_p7)
}
  0x11   :  { %s190_s22 = smov 128   ;;  %s191_s23 = smov 8  }
  0x12   :  { %22 = dma.hbm_to_vmem [thread:$0]  %s265_s0, 256, %s17_s13, [#allocation3], %s190_s22, %s190_s22, %s191_s23  }
  0x13   :  { %s192_s26 = smov [#allocation5]   ;;  %s139_s30 = scalar_lea.hbm %s266_s1, 256 }
  0x14   :  { %s28_s27 = sshll.u32 %s192_s26, 4  ;;  %p140_p8 = scmp.ne.s32.totalorder %s266_s1, %s139_s30  ;;  %s29_s27 = int_to_ptr.vmem [resolvable:$true] %s28_s27 }
  0x15   :  { %p143_p9 = scmp.lt.u32.totalorder %s139_s30, %s266_s1 }
  0x17   :  { %p145_p10 = pnand %p143_p9, %p140_p8 }
  0x19   :  { %148 = shalt.err (!%p145_p10)
}
  0x1a   :  { %s149_s8 = scalar_lea.vmem %s29_s27, 256  ;;  %p154_p12 = scmp.lt.s32.totalorder %s29_s27, %s29_s27 }
  0x1b   :  { %p150_p11 = scmp.ne.s32.totalorder %s29_s27, %s149_s8  ;;  %p155_p13 = scmp.lt.s32.totalorder %s149_s8, %s149_s8 }
  0x1d   :  { %p156_p0 = por %p155_p13, %p154_p12 }
  0x1f   :  { %p157_p1 = pnand %p156_p0, %p150_p11 }
  0x21   :  { %160 = shalt.err (!%p157_p1)
}
  0x22   :  { %34 = dma.hbm_to_vmem [thread:$0]  %s266_s1, 256, %s29_s27, [#allocation6], %s190_s22, %s190_s22, %s191_s23  }
  0x23   :  { %183 = dma.done.wait [#allocation3], 256  }
  0x24   :  { %184 = vsyncadd [#allocation3], 4294967040 }
  0x25   :  { %185 = dma.done.wait [#allocation6], 256  }
  0x26   :  { %186 = vsyncadd [#allocation6], 4294967040  ;;  %v43_v0 = vld [vmem:[#allocation2] sm:$0xff]  ;;  %v45_v1 = vld [vmem:[#allocation5] sm:$0xff]  ;;  %s193_s13 = smov [#allocation7]  }
  0x27   :  { %v44_v2 = vld [vmem:[#allocation2 + $0x8] sm:$0xff]  ;;  %v47_v3 = vadd.f32 %v45_v1, %v43_v0  ;;  %v46_v4 = vld [vmem:[#allocation5 + $0x8] sm:$0xff]  ;;  %v106_v21 = vld [vmem:[%s267_s2] ss:$0 sm:$0xff]  ;;  %s93_s14 = sshll.u32 %s193_s13, 4  ;;  %s94_s14 = int_to_ptr.vmem [resolvable:$true] %s93_s14 }
  0x28   :  { %v48_v5 = vadd.f32 %v46_v4, %v44_v2  ;;  %v107_v23 = vld [vmem:[%s267_s2 + $0x1] ss:$0 sm:$0xff]  ;;  %s161_s15 = scalar_lea.vmem %s94_s14, 256  ;;  %p166_p3 = scmp.lt.s32.totalorder %s94_s14, %s94_s14 }
  0x29   :  { %49 = vadd.xlane.f32.xlu0 %v47_v3  ;;  %p162_p2 = scmp.ne.s32.totalorder %s94_s14, %s161_s15  ;;  %p167_p4 = scmp.lt.s32.totalorder %s161_s15, %s161_s15 }
  0x2b   :  { %p168_p5 = por %p167_p4, %p166_p3 }
  0x2d   :  { %51 = vadd.xlane.f32.xlu0 %v48_v5  ;;  %p169_p6 = pnand %p168_p5, %p162_p2 }
  0xb6   :  { %v50_v6 = vpop.xlane.xlu0 %49 }
  0xb7   :  { %v54_v7 = vmul.f32 0.0078125, %v50_v6 }
  0xb9   :  { %v56_v8 = vsub.f32 %v47_v3, %v54_v7 }
  0xba   :  { %v52_v9 = vpop.xlane.xlu0 %51 }
  0xbb   :  { %v55_v10 = vmul.f32 0.0078125, %v52_v9  ;;  %v58_v11 = vmul.f32 %v56_v8, %v56_v8 }
  0xbd   :  { %v57_v12 = vsub.f32 %v48_v5, %v55_v10  ;;  %60 = vadd.xlane.f32.xlu1 %v58_v11 }
  0xbf   :  { %v59_v13 = vmul.f32 %v57_v12, %v57_v12 }
  0xc1   :  { %62 = vadd.xlane.f32.xlu1 %v59_v13 }
 0x14a   :  { %v61_v14 = vpop.xlane.xlu1 %60 }
 0x14b   :  { %v64_v15 = vmul.f32 0.0078125, %v61_v14 }
 0x14d   :  { %v66_v16 = vadd.f32 1e-05, %v64_v15 }
 0x14e   :  { %v63_v17 = vpop.xlane.xlu1 %62 }
 0x14f   :  { %113 = vrsqrt.f32 %v66_v16  ;;  %v65_v18 = vmul.f32 0.0078125, %v63_v17 }
 0x151   :  { %v67_v19 = vadd.f32 1e-05, %v65_v18 }
 0x153   :  { %115 = vrsqrt.f32 %v67_v19 }
 0x159   :  { %v114_v20 = vpop.eup %113 }
 0x15a   :  { %v72_v22 = vmul.f32 %v114_v20, %v56_v8 }
 0x15c   :  { %v78_v24 = vmul.f32 %v106_v21, %v72_v22 }
 0x15d   :  { %v116_v25 = vpop.eup %115 }
 0x15e   :  { %v73_v26 = vmul.f32 %v116_v25, %v57_v12  ;;  %v84_v27 = vadd.f32 %v107_v23, %v78_v24 }
 0x160   :  { %v79_v28 = vmul.f32 %v106_v21, %v73_v26  ;;  %86 = vst [vmem:[#allocation7] sm:$0xff] %v84_v27 }
 0x162   :  { %v85_v29 = vadd.f32 %v107_v23, %v79_v28 }
 0x164   :  { %87 = vst [vmem:[#allocation7 + $0x8] sm:$0xff] %v85_v29 }
 0x165   :  { %172 = shalt.err (!%p169_p6)
}
 0x166   :  { %s173_s17 = scalar_lea.hbm %s268_s3, 256 }
 0x167   :  { %p174_p7 = scmp.ne.s32.totalorder %s268_s3, %s173_s17  ;;  %p177_p8 = scmp.lt.u32.totalorder %s173_s17, %s268_s3 }
 0x169   :  { %p179_p9 = pnand %p177_p8, %p174_p7 }
 0x16b   :  { %182 = shalt.err (!%p179_p9)
}
 0x16c   :  { %99 = dma.vmem_to_hbm [thread:$0]  %s94_s14, 256, %s268_s3, [#allocation4], %s190_s22, %s190_s22, %s191_s23  }
 0x16d   :  { %187 = dma.done.wait [#allocation4], 256  }
 0x16e   :  { %188 = vsyncadd [#allocation4], 4294967040 }
 0x16f   :  { %103 = vsyncpa [#allocation3], 1 }
 0x170   :  { %104 = vsyncpa [#allocation6], 1 }
 0x171   :  { %105 = vsyncpa [#allocation4], 1 }

</bundles_post_ra>
